<compile_context>
chip_gen: v7x
topology: tpu7x:2x2x1
jax: 0.10.0
libtpu: 0.0.40
codegen_flags: <defaults>
</compile_context>

<pallas_src>
import numpy as np
import jax
import jax.numpy as jnp
from jax.experimental import pallas as pl
from jax.experimental.pallas import tpu as pltpu

# ---------------- synthetic ACOPF "data" configuration ----------------
NBUS = 16
NGEN = 8
NLOAD = 8
NBRANCH = 24
NLAYER = 2          # args['nlayer']
HIDDEN_FRAC = 1.0   # args['hiddenfrac']
BATCH = 16          # >= 2 grid steps at tb=8 so the parallel axis spans both v7x TCs

XDIM = 2 * NLOAD
NPG, NQG, NVM, NDVA = NGEN, NGEN, NBUS, NBRANCH
YDIM = NPG + NQG + NVM + NDVA
NHIDDEN = int(HIDDEN_FRAC * YDIM)

# output slab layout (lane-dense, padded to a multiple of 128)
_SLAB_RAW = YDIM + 2 * NBUS + 4 * NBRANCH          # 56 + 32 + 96 = 184
OUT_W = ((_SLAB_RAW + 127) // 128) * 128           # 256


def _make_kernel(nlayer, nhidden, npg, nqg, nvm, ndva, nbus, nbranch, ydim,
                 out_w, matmul_dtype):
    n_gen2 = npg + nqg                # columns of y feeding the gen->bus aggregation
    n_sel = n_gen2 + nvm              # columns of y feeding the fused incidence matmul

    def kernel(*refs):
        it = iter(refs)
        x_ref = next(it)
        trunk_w = [next(it) for _ in range(nlayer)]     # (in, out) weight matrices
        hw1_ref = next(it)            # (nhidden, ydim)   fused head layer-1 weights
        hw2_ref = next(it)            # (ydim, ydim)      block-diag head layer-2 weights
        inc_ref = next(it)            # (n_sel, 128)      fused incidence (zero-padded)
        rowc_ref = next(it)           # (nlayer+6, W)     packed row-vector constants
        out_ref = next(it)            # (tb, out_w)       single output slab

        tb = x_ref.shape[0]
        rc = rowc_ref[...]            # one load; static row/col slices below

        # ---- trunk MLP: (Linear + ReLU) * nlayer ----
        h = x_ref[...]
        for l in range(nlayer):
            b = rc[l:l + 1, 0:nhidden]
            h = jnp.dot(h.astype(matmul_dtype), trunk_w[l][...],
                        preferred_element_type=jnp.float32) + b
            h = jnp.maximum(h, 0.0)

        hb1 = rc[nlayer + 0:nlayer + 1, 0:ydim]
        hb2 = rc[nlayer + 1:nlayer + 2, 0:ydim]
        lo = rc[nlayer + 2:nlayer + 3, 0:ydim]
        span = rc[nlayer + 3:nlayer + 4, 0:ydim]
        g_row = rc[nlayer + 4:nlayer + 5, 0:nbranch]
        b_row = rc[nlayer + 5:nlayer + 6, 0:nbranch]

        # ---- fused heads: one Linear -> ReLU -> one block-diag Linear ----
        t = jnp.maximum(
            jnp.dot(h.astype(matmul_dtype), hw1_ref[...],
                    preferred_element_type=jnp.float32) + hb1, 0.0)
        y = jnp.dot(t.astype(matmul_dtype), hw2_ref[...],
                    preferred_element_type=jnp.float32) + hb2
        # torch.nn.Hardsigmoid: clip(x/6 + 1/2, 0, 1)   (multiply, keep EUP free)
        y = jnp.clip(y * (1.0 / 6.0) + 0.5, 0.0, 1.0)
        y = span * y + lo                                  # rescale to [lo, hi], f32

        # ---- fused gen->bus aggregation + per-branch vm gather (one MXU matmul) ----
        # y[:, :n_sel] = [pg | qg | vm]; inc = block_diag(gen2bus_bd, [cf|ct]) padded
        # to 128 cols, so agg is exactly one vreg wide.
        agg = jnp.dot(y[:, 0:n_sel], inc_ref[...], preferred_element_type=jnp.float32)
        pgqg_bus = agg[:, 0:2 * nbus]                      # (tb, 2*nbus)
        vmf = agg[:, 2 * nbus:2 * nbus + nbranch]
        vmt = agg[:, 2 * nbus + nbranch:2 * nbus + 2 * nbranch]

        # ---- branch flows ----
        # TODO(synk): data.compute_flow() is external to the module; standard pi-model
        # AC branch-flow equations (no tap/shift/charging) are used in its place.
        dva = y[:, n_sel:n_sel + ndva]
        # Hoist g/b broadcasts once (JAX does not CSE broadcast_in_dim).
        g = jnp.broadcast_to(g_row, (tb, nbranch))
        b = jnp.broadcast_to(b_row, (tb, nbranch))
        cosd = jnp.cos(dva)
        sind = jnp.sin(dva)
        gc = g * cosd
        bs = b * sind
        gs = g * sind
        bc = b * cosd
        vmf2 = vmf * vmf
        vmt2 = vmt * vmt
        vft = vmf * vmt
        pf = g * vmf2 - vft * (gc + bs)
        qf = -b * vmf2 - vft * (gs - bc)
        pt = g * vmt2 - vft * (gc - bs)
        qt = -b * vmt2 + vft * (gs + bc)

        # ---- single lane-dense whole-block store of the fused output slab ----
        pad = out_w - (ydim + 2 * nbus + 4 * nbranch)
        pieces = [y, pgqg_bus, pf, qf, pt, qt]
        if pad > 0:
            pieces.append(jnp.zeros((tb, pad), jnp.float32))
        out_ref[...] = jnp.concatenate(pieces, axis=1)

    return kernel


def _pick_tb(batch):
    """Largest batch tile <= 1024 that (a) divides the batch, (b) is a multiple of 8
    (sublane alignment) and (c) leaves >= 2 grid steps (so dimension_semantics=
    ("parallel",) can shard across both v7x TensorCores).  Falls back to the full
    batch (block == full dim is always legal), so odd batch sizes never assert."""
    divisors = [t for t in range(8, min(batch, 1024) + 1, 8) if batch % t == 0]
    if not divisors:
        return batch
    two_step = [t for t in divisors if batch // t >= 2]
    return max(two_step) if two_step else max(divisors)


def nn_primal_acopf_solver(pd, qd, params, consts, *, tb=None,
                           matmul_dtype=jnp.float32):
    x = jnp.concatenate([pd, qd], axis=1)           # torch.cat([pd, qd], dim=1)
    B, xdim = x.shape
    if tb is None:
        tb = _pick_tb(B)

    # ---- host-side packing (fewer, larger matmuls and DMAs) ----
    w1s, b1s, w2s, b2s = zip(*params['heads'])
    head_w1 = jnp.concatenate(w1s, axis=1)                        # (NHIDDEN, YDIM)
    head_b1 = jnp.concatenate(b1s, axis=1)                        # (1, YDIM)
    head_w2 = jax.scipy.linalg.block_diag(*w2s)                   # (YDIM, YDIM)
    head_b2 = jnp.concatenate(b2s, axis=1)                        # (1, YDIM)
    los, his = zip(*consts['bounds'])
    lo = jnp.concatenate(los, axis=1)                             # (1, YDIM)
    span = jnp.concatenate(his, axis=1) - lo                      # (1, YDIM)

    # fused incidence: [pg|qg|vm] @ inc -> [pg_bus | qg_bus | vmf | vmt], padded to 128
    gen2bus_bd = jax.scipy.linalg.block_diag(consts['gen2bus'],
                                             consts['gen2bus'])   # (2*NGEN, 2*NBUS)
    cfct = jnp.concatenate([consts['cf'], consts['ct']], axis=1)  # (NBUS, 2*NBRANCH)
    inc = jax.scipy.linalg.block_diag(gen2bus_bd, cfct)           # (2G+NBUS, 2NBUS+2NBR)
    if inc.shape[1] < 128:
        inc = jnp.pad(inc, ((0, 0), (0, 128 - inc.shape[1])))     # vreg-dense result

    # all (1, W) constants packed into one row-constant array -> one DMA / VMEM tile
    row_vecs = [b for (_, b) in params['hidden']] + [head_b1, head_b2, lo, span,
                                                     consts['g_br'], consts['b_br']]
    rw = max(int(v.shape[1]) for v in row_vecs)
    rowconsts = jnp.concatenate(
        [jnp.pad(v, ((0, 0), (0, rw - int(v.shape[1])))) for v in row_vecs], axis=0)

    # MXU-operand dtype (bf16 on v6e/v7x halves weight DMA bytes; f32 accumulate)
    trunk_ws = [w.astype(matmul_dtype) for (w, _) in params['hidden']]
    head_w1 = head_w1.astype(matmul_dtype)
    head_w2 = head_w2.astype(matmul_dtype)

    inputs = [x] + trunk_ws + [head_w1, head_w2, inc, rowconsts]

    def batch_spec(feat):
        return pl.BlockSpec((tb, feat), lambda i: (i, 0))

    def const_spec(arr):
        return pl.BlockSpec(arr.shape, lambda i: (0,) * arr.ndim)

    in_specs = [batch_spec(xdim)] + [const_spec(a) for a in inputs[1:]]
    out_shape = jax.ShapeDtypeStruct((B, OUT_W), jnp.float32)
    out_specs = batch_spec(OUT_W)

    fn = pl.pallas_call(
        _make_kernel(NLAYER, NHIDDEN, NPG, NQG, NVM, NDVA, NBUS, NBRANCH, YDIM,
                     OUT_W, matmul_dtype),
        out_shape=out_shape,
        grid_spec=pltpu.PrefetchScalarGridSpec(
            num_scalar_prefetch=0,
            grid=(pl.cdiv(B, tb),),
            in_specs=in_specs,
            out_specs=out_specs,
        ),
        compiler_params=pltpu.CompilerParams(
            dimension_semantics=("parallel",)),
    )
    slab = fn(*inputs)

    # ---- slice the fused slab back into the module's output dict ----
    o_vm = NPG + NQG
    o_dva = o_vm + NVM
    o_pgbus = YDIM
    o_qgbus = YDIM + NBUS
    o_flow = YDIM + 2 * NBUS
    return {
        'pg': slab[:, 0:NPG],
        'qg': slab[:, NPG:NPG + NQG],
        'vm': slab[:, o_vm:o_vm + NVM],
        'dva': slab[:, o_dva:o_dva + NDVA],
        'pg_bus': slab[:, o_pgbus:o_pgbus + NBUS],
        'qg_bus': slab[:, o_qgbus:o_qgbus + NBUS],
        'flow': slab[:, o_flow:o_flow + 4 * NBRANCH],
    }


# ---------------- deterministic parameter / constant construction ----------------
def _linear_init(key, fan_in, fan_out):
    kw, kb = jax.random.split(key)
    bound = 1.0 / np.sqrt(fan_in)
    w = jax.random.uniform(kw, (fan_in, fan_out), jnp.float32, -bound, bound)
    b = jax.random.uniform(kb, (1, fan_out), jnp.float32, -bound, bound)
    return w, b


def make_params(key):
    layer_sizes = [XDIM] + NLAYER * [NHIDDEN]
    hidden = []
    for a, b_ in zip(layer_sizes[:-1], layer_sizes[1:]):
        key, sub = jax.random.split(key)
        hidden.append(_linear_init(sub, a, b_))
    heads = []
    for n in (NPG, NQG, NVM, NDVA):
        key, s1 = jax.random.split(key)
        key, s2 = jax.random.split(key)
        w1, b1 = _linear_init(s1, NHIDDEN, n)
        w2, b2 = _linear_init(s2, n, n)
        heads.append((w1, b1, w2, b2))
    return {'hidden': hidden, 'heads': heads}


def make_consts():
    pgmin = jnp.zeros((1, NPG), jnp.float32)
    pgmax = jnp.linspace(1.0, 2.0, NPG, dtype=jnp.float32).reshape(1, NPG)
    qgmin = -jnp.ones((1, NQG), jnp.float32)
    qgmax = jnp.ones((1, NQG), jnp.float32)
    vmmin = jnp.full((1, NVM), 0.94, jnp.float32)
    vmmax = jnp.full((1, NVM), 1.06, jnp.float32)
    dvamin = jnp.full((1, NDVA), -np.pi / 6.0, jnp.float32)
    dvamax = jnp.full((1, NDVA), np.pi / 6.0, jnp.float32)

    # deterministic gen->bus map; pg @ gen2bus == pg_pad[:, bus_genidxs].sum(dim=2)
    gen_bus = np.array([(2 * g + 1) % NBUS for g in range(NGEN)])
    gen2bus = np.zeros((NGEN, NBUS), np.float32)
    gen2bus[np.arange(NGEN), gen_bus] = 1.0

    f_bus = np.arange(NBRANCH) % NBUS
    t_bus = (np.arange(NBRANCH) + 3) % NBUS
    cf = np.zeros((NBUS, NBRANCH), np.float32)
    ct = np.zeros((NBUS, NBRANCH), np.float32)
    cf[f_bus, np.arange(NBRANCH)] = 1.0
    ct[t_bus, np.arange(NBRANCH)] = 1.0

    g_br = (1.0 + 0.05 * np.arange(NBRANCH)).astype(np.float32).reshape(1, NBRANCH)
    b_br = (-8.0 + 0.1 * np.arange(NBRANCH)).astype(np.float32).reshape(1, NBRANCH)

    bounds = [(pgmin, pgmax), (qgmin, qgmax), (vmmin, vmmax), (dvamin, dvamax)]
    return {'bounds': bounds, 'gen2bus': jnp.asarray(gen2bus),
            'cf': jnp.asarray(cf), 'ct': jnp.asarray(ct),
            'g_br': jnp.asarray(g_br), 'b_br': jnp.asarray(b_br)}


# ---------------- pure-JAX reference (unpacked params, same math) ----------------
def reference(pd, qd, params, consts, matmul_dtype=jnp.float32):
    x = jnp.concatenate([pd, qd], axis=1)
    h = x
    for w, b in params['hidden']:
        h = jnp.maximum(jnp.dot(h.astype(matmul_dtype), w.astype(matmul_dtype),
                                preferred_element_type=jnp.float32) + b, 0.0)
    outs = []
    for (w1, b1, w2, b2), (lo_, hi_) in zip(params['heads'], consts['bounds']):
        t = jnp.maximum(jnp.dot(h.astype(matmul_dtype), w1.astype(matmul_dtype),
                                preferred_element_type=jnp.float32) + b1, 0.0)
        t = jnp.dot(t.astype(matmul_dtype), w2.astype(matmul_dtype),
                    preferred_element_type=jnp.float32) + b2
        t = jnp.clip(t / 6.0 + 0.5, 0.0, 1.0)
        outs.append((hi_ - lo_) * t + lo_)
    pg, qg, vm, dva = outs
    pg_bus = pg @ consts['gen2bus']
    qg_bus = qg @ consts['gen2bus']
    vmf = vm @ consts['cf']
    vmt = vm @ consts['ct']
    g, b = consts['g_br'], consts['b_br']
    cosd, sind = jnp.cos(dva), jnp.sin(dva)
    vft = vmf * vmt
    pf = g * vmf * vmf - vft * (g * cosd + b * sind)
    qf = -b * vmf * vmf - vft * (g * sind - b * cosd)
    pt = g * vmt * vmt - vft * (g * cosd - b * sind)
    qt = -b * vmt * vmt + vft * (g * sind + b * cosd)
    flow = jnp.concatenate([pf, qf, pt, qt], axis=1)
    return {'pg': pg, 'qg': qg, 'pg_bus': pg_bus, 'qg_bus': qg_bus,
            'vm': vm, 'dva': dva, 'flow': flow}


if __name__ == "__main__":
    key = jax.random.PRNGKey(0)
    kpd, kqd = jax.random.split(key)
    pd = jax.random.uniform(kpd, (BATCH, NLOAD), jnp.float32, 0.0, 1.0)
    qd = jax.random.uniform(kqd, (BATCH, NLOAD), jnp.float32, -0.3, 0.3)

    params = make_params(jax.random.PRNGKey(42))
    consts = make_consts()

    # --- f32 MXU operands: matches the PyTorch module's numerics ---
    out_f32 = nn_primal_acopf_solver(pd, qd, params, consts,
                                     matmul_dtype=jnp.float32)
    jax.block_until_ready(out_f32)
    ref_f32 = reference(pd, qd, params, consts, matmul_dtype=jnp.float32)
    for k in out_f32:
        np.testing.assert_allclose(np.asarray(out_f32[k]), np.asarray(ref_f32[k]),
                                   rtol=5e-2, atol=5e-2)

    # --- bf16 MXU operands (f32 accumulate): production mode for v6e/v7x.
    # Validated against a reference applying the same operand casts, so the check
    # isolates kernel-structure correctness from the deliberate precision choice.
    out_bf16 = nn_primal_acopf_solver(pd, qd, params, consts,
                                      matmul_dtype=jnp.bfloat16)
    jax.block_until_ready(out_bf16)
    ref_bf16 = reference(pd, qd, params, consts, matmul_dtype=jnp.bfloat16)
    for k in out_bf16:
        np.testing.assert_allclose(np.asarray(out_bf16[k]), np.asarray(ref_bf16[k]),
                                   rtol=5e-2, atol=5e-2)

    print("KERNEL_OK")
</pallas_src>

<mosaic_0001>
module attributes {stable_mosaic.version = 11 : i64} {
  func.func @kernel(%arg0: i32, %arg1: memref<8x16xf32, #tpu.memory_space<vmem>>, %arg2: memref<16x56xf32, #tpu.memory_space<vmem>>, %arg3: memref<56x56xf32, #tpu.memory_space<vmem>>, %arg4: memref<56x56xf32, #tpu.memory_space<vmem>>, %arg5: memref<56x56xf32, #tpu.memory_space<vmem>>, %arg6: memref<32x128xf32, #tpu.memory_space<vmem>>, %arg7: memref<8x56xf32, #tpu.memory_space<vmem>>, %arg8: memref<8x256xf32, #tpu.memory_space<vmem>>) attributes {dimension_semantics = [#tpu.dimension_semantics<parallel>], iteration_bounds = array<i64: 2>, scalar_prefetch = 0 : i64, scratch_operands = 0 : i64, tpu.core_type = #tpu.core_type<tc>, window_params = [{transform_indices = @transform_0, window_bounds = array<i64: 8, 16>}, {pipeline_mode = #tpu.pipeline_mode<synchronous>, transform_indices = @transform_1, window_bounds = array<i64: 16, 56>}, {pipeline_mode = #tpu.pipeline_mode<synchronous>, transform_indices = @transform_2, window_bounds = array<i64: 56, 56>}, {pipeline_mode = #tpu.pipeline_mode<synchronous>, transform_indices = @transform_3, window_bounds = array<i64: 56, 56>}, {pipeline_mode = #tpu.pipeline_mode<synchronous>, transform_indices = @transform_4, window_bounds = array<i64: 56, 56>}, {pipeline_mode = #tpu.pipeline_mode<synchronous>, transform_indices = @transform_5, window_bounds = array<i64: 32, 128>}, {pipeline_mode = #tpu.pipeline_mode<synchronous>, transform_indices = @transform_6, window_bounds = array<i64: 8, 56>}, {transform_indices = @transform_7, window_bounds = array<i64: 8, 256>}]} {
    %c0 = arith.constant 0 : index
    %c0_0 = arith.constant 0 : index
    %0 = vector.load %arg7[%c0, %c0_0] : memref<8x56xf32, #tpu.memory_space<vmem>>, vector<8x56xf32>
    %c0_1 = arith.constant 0 : index
    %c0_2 = arith.constant 0 : index
    %1 = vector.load %arg1[%c0_1, %c0_2] : memref<8x16xf32, #tpu.memory_space<vmem>>, vector<8x16xf32>
    %2 = vector.extract_strided_slice %0 {offsets = [0, 0], sizes = [1, 56], strides = [1, 1]} : vector<8x56xf32> to vector<1x56xf32>
    %c0_3 = arith.constant 0 : index
    %c0_4 = arith.constant 0 : index
    %3 = vector.load %arg2[%c0_3, %c0_4] : memref<16x56xf32, #tpu.memory_space<vmem>>, vector<16x56xf32>
    %cst = arith.constant dense<0.000000e+00> : vector<8x56xf32>
    %4 = tpu.matmul %1, %3, %cst {dimension_numbers = #tpu.dot_dimension_numbers<[1], [0], [0], [1], [0, 0, 1, 1], [], []>} : vector<8x16xf32>, vector<16x56xf32>, vector<8x56xf32> -> vector<8x56xf32>
    %5 = vector.broadcast %2 : vector<1x56xf32> to vector<8x56xf32>
    %6 = arith.addf %4, %5 : vector<8x56xf32>
    %cst_5 = arith.constant 0.000000e+00 : f32
    %7 = vector.broadcast %cst_5 : f32 to vector<8x56xf32>
    %8 = arith.maximumf %6, %7 : vector<8x56xf32>
    %9 = vector.extract_strided_slice %0 {offsets = [1, 0], sizes = [1, 56], strides = [1, 1]} : vector<8x56xf32> to vector<1x56xf32>
    %c0_6 = arith.constant 0 : index
    %c0_7 = arith.constant 0 : index
    %10 = vector.load %arg3[%c0_6, %c0_7] : memref<56x56xf32, #tpu.memory_space<vmem>>, vector<56x56xf32>
    %cst_8 = arith.constant dense<0.000000e+00> : vector<8x56xf32>
    %11 = tpu.matmul %8, %10, %cst_8 {dimension_numbers = #tpu.dot_dimension_numbers<[1], [0], [0], [1], [0, 0, 1, 1], [], []>} : vector<8x56xf32>, vector<56x56xf32>, vector<8x56xf32> -> vector<8x56xf32>
    %12 = vector.broadcast %9 : vector<1x56xf32> to vector<8x56xf32>
    %13 = arith.addf %11, %12 : vector<8x56xf32>
    %cst_9 = arith.constant 0.000000e+00 : f32
    %14 = vector.broadcast %cst_9 : f32 to vector<8x56xf32>
    %15 = arith.maximumf %13, %14 : vector<8x56xf32>
    %16 = vector.extract_strided_slice %0 {offsets = [2, 0], sizes = [1, 56], strides = [1, 1]} : vector<8x56xf32> to vector<1x56xf32>
    %17 = vector.extract_strided_slice %0 {offsets = [3, 0], sizes = [1, 56], strides = [1, 1]} : vector<8x56xf32> to vector<1x56xf32>
    %18 = vector.extract_strided_slice %0 {offsets = [4, 0], sizes = [1, 56], strides = [1, 1]} : vector<8x56xf32> to vector<1x56xf32>
    %19 = vector.extract_strided_slice %0 {offsets = [5, 0], sizes = [1, 56], strides = [1, 1]} : vector<8x56xf32> to vector<1x56xf32>
    %20 = vector.extract_strided_slice %0 {offsets = [6, 0], sizes = [1, 24], strides = [1, 1]} : vector<8x56xf32> to vector<1x24xf32>
    %21 = vector.extract_strided_slice %0 {offsets = [7, 0], sizes = [1, 24], strides = [1, 1]} : vector<8x56xf32> to vector<1x24xf32>
    %c0_10 = arith.constant 0 : index
    %c0_11 = arith.constant 0 : index
    %22 = vector.load %arg4[%c0_10, %c0_11] : memref<56x56xf32, #tpu.memory_space<vmem>>, vector<56x56xf32>
    %cst_12 = arith.constant dense<0.000000e+00> : vector<8x56xf32>
    %23 = tpu.matmul %15, %22, %cst_12 {dimension_numbers = #tpu.dot_dimension_numbers<[1], [0], [0], [1], [0, 0, 1, 1], [], []>} : vector<8x56xf32>, vector<56x56xf32>, vector<8x56xf32> -> vector<8x56xf32>
    %24 = vector.broadcast %16 : vector<1x56xf32> to vector<8x56xf32>
    %25 = arith.addf %23, %24 : vector<8x56xf32>
    %cst_13 = arith.constant 0.000000e+00 : f32
    %26 = vector.broadcast %cst_13 : f32 to vector<8x56xf32>
    %27 = arith.maximumf %25, %26 : vector<8x56xf32>
    %c0_14 = arith.constant 0 : index
    %c0_15 = arith.constant 0 : index
    %28 = vector.load %arg5[%c0_14, %c0_15] : memref<56x56xf32, #tpu.memory_space<vmem>>, vector<56x56xf32>
    %cst_16 = arith.constant dense<0.000000e+00> : vector<8x56xf32>
    %29 = tpu.matmul %27, %28, %cst_16 {dimension_numbers = #tpu.dot_dimension_numbers<[1], [0], [0], [1], [0, 0, 1, 1], [], []>} : vector<8x56xf32>, vector<56x56xf32>, vector<8x56xf32> -> vector<8x56xf32>
    %30 = vector.broadcast %17 : vector<1x56xf32> to vector<8x56xf32>
    %31 = arith.addf %29, %30 : vector<8x56xf32>
    %cst_17 = arith.constant 0.166666672 : f32
    %32 = vector.broadcast %cst_17 : f32 to vector<8x56xf32>
    %33 = arith.mulf %31, %32 : vector<8x56xf32>
    %cst_18 = arith.constant 5.000000e-01 : f32
    %34 = vector.broadcast %cst_18 : f32 to vector<8x56xf32>
    %35 = arith.addf %33, %34 : vector<8x56xf32>
    %cst_19 = arith.constant 0.000000e+00 : f32
    %cst_20 = arith.constant 1.000000e+00 : f32
    %36 = vector.broadcast %cst_19 : f32 to vector<8x56xf32>
    %37 = arith.maximumf %36, %35 : vector<8x56xf32>
    %38 = vector.broadcast %cst_20 : f32 to vector<8x56xf32>
    %39 = arith.minimumf %38, %37 : vector<8x56xf32>
    %40 = vector.broadcast %19 : vector<1x56xf32> to vector<8x56xf32>
    %41 = arith.mulf %40, %39 : vector<8x56xf32>
    %42 = vector.broadcast %18 : vector<1x56xf32> to vector<8x56xf32>
    %43 = arith.addf %41, %42 : vector<8x56xf32>
    %44 = vector.extract_strided_slice %43 {offsets = [0, 0], sizes = [8, 32], strides = [1, 1]} : vector<8x56xf32> to vector<8x32xf32>
    %c0_21 = arith.constant 0 : index
    %c0_22 = arith.constant 0 : index
    %45 = vector.load %arg6[%c0_21, %c0_22] : memref<32x128xf32, #tpu.memory_space<vmem>>, vector<32x128xf32>
    %cst_23 = arith.constant dense<0.000000e+00> : vector<8x128xf32>
    %46 = tpu.matmul %44, %45, %cst_23 {dimension_numbers = #tpu.dot_dimension_numbers<[1], [0], [0], [1], [0, 0, 1, 1], [], []>} : vector<8x32xf32>, vector<32x128xf32>, vector<8x128xf32> -> vector<8x128xf32>
    %47 = vector.extract_strided_slice %46 {offsets = [0, 0], sizes = [8, 32], strides = [1, 1]} : vector<8x128xf32> to vector<8x32xf32>
    %48 = vector.extract_strided_slice %46 {offsets = [0, 32], sizes = [8, 24], strides = [1, 1]} : vector<8x128xf32> to vector<8x24xf32>
    %49 = vector.extract_strided_slice %46 {offsets = [0, 56], sizes = [8, 24], strides = [1, 1]} : vector<8x128xf32> to vector<8x24xf32>
    %50 = vector.extract_strided_slice %43 {offsets = [0, 32], sizes = [8, 24], strides = [1, 1]} : vector<8x56xf32> to vector<8x24xf32>
    %51 = vector.shape_cast %20 : vector<1x24xf32> to vector<1x24xf32>
    %52 = vector.broadcast %51 : vector<1x24xf32> to vector<8x24xf32>
    %53 = vector.shape_cast %21 : vector<1x24xf32> to vector<1x24xf32>
    %54 = vector.broadcast %53 : vector<1x24xf32> to vector<8x24xf32>
    %55 = math.cos %50 : vector<8x24xf32>
    %56 = math.sin %50 : vector<8x24xf32>
    %57 = arith.mulf %52, %55 : vector<8x24xf32>
    %58 = arith.mulf %54, %56 : vector<8x24xf32>
    %59 = arith.mulf %52, %56 : vector<8x24xf32>
    %60 = arith.mulf %54, %55 : vector<8x24xf32>
    %61 = arith.mulf %48, %48 : vector<8x24xf32>
    %62 = arith.mulf %49, %49 : vector<8x24xf32>
    %63 = arith.mulf %48, %49 : vector<8x24xf32>
    %64 = arith.mulf %52, %61 : vector<8x24xf32>
    %65 = arith.addf %57, %58 : vector<8x24xf32>
    %66 = arith.mulf %63, %65 : vector<8x24xf32>
    %67 = arith.subf %64, %66 : vector<8x24xf32>
    %cst_24 = arith.constant 0.000000e+00 : f32
    %68 = vector.broadcast %cst_24 : f32 to vector<8x24xf32>
    %69 = arith.subf %68, %54 : vector<8x24xf32>
    %70 = arith.mulf %69, %61 : vector<8x24xf32>
    %71 = arith.subf %59, %60 : vector<8x24xf32>
    %72 = arith.mulf %63, %71 : vector<8x24xf32>
    %73 = arith.subf %70, %72 : vector<8x24xf32>
    %74 = arith.mulf %52, %62 : vector<8x24xf32>
    %75 = arith.subf %57, %58 : vector<8x24xf32>
    %76 = arith.mulf %63, %75 : vector<8x24xf32>
    %77 = arith.subf %74, %76 : vector<8x24xf32>
    %cst_25 = arith.constant 0.000000e+00 : f32
    %78 = vector.broadcast %cst_25 : f32 to vector<8x24xf32>
    %79 = arith.subf %78, %54 : vector<8x24xf32>
    %80 = arith.mulf %79, %62 : vector<8x24xf32>
    %81 = arith.addf %59, %60 : vector<8x24xf32>
    %82 = arith.mulf %63, %81 : vector<8x24xf32>
    %83 = arith.addf %80, %82 : vector<8x24xf32>
    %cst_26 = arith.constant 0.000000e+00 : f32
    %84 = vector.broadcast %cst_26 : f32 to vector<8x72xf32>
    %85 = tpu.concatenate %43, %47, %67, %73, %77, %83, %84 in 1 : vector<8x56xf32>, vector<8x32xf32>, vector<8x24xf32>, vector<8x24xf32>, vector<8x24xf32>, vector<8x24xf32>, vector<8x72xf32> -> vector<8x256xf32>
    %c0_27 = arith.constant 0 : index
    %c0_28 = arith.constant 0 : index
    %86 = vector.load %arg8[%c0_27, %c0_28] : memref<8x256xf32, #tpu.memory_space<vmem>>, vector<8x256xf32>
    tpu.vector_store %arg8[%c0_27, %c0_28], %85 {strides = array<i32>} : memref<8x256xf32, #tpu.memory_space<vmem>>, vector<8x256xf32>,
    return
  }
  func.func @transform_0(%arg0: i32) -> (i32, i32) {
    %c0_i32 = arith.constant 0 : i32
    %c0_i32_0 = arith.constant 0 : i32
    return %arg0, %c0_i32 : i32, i32
  }
  func.func @transform_1(%arg0: i32) -> (i32, i32) {
    %c0_i32 = arith.constant 0 : i32
    %c0_i32_0 = arith.constant 0 : i32
    %c0_i32_1 = arith.constant 0 : i32
    return %c0_i32, %c0_i32_0 : i32, i32
  }
  func.func @transform_2(%arg0: i32) -> (i32, i32) {
    %c0_i32 = arith.constant 0 : i32
    %c0_i32_0 = arith.constant 0 : i32
    %c0_i32_1 = arith.constant 0 : i32
    return %c0_i32, %c0_i32_0 : i32, i32
  }
  func.func @transform_3(%arg0: i32) -> (i32, i32) {
    %c0_i32 = arith.constant 0 : i32
    %c0_i32_0 = arith.constant 0 : i32
    %c0_i32_1 = arith.constant 0 : i32
    return %c0_i32, %c0_i32_0 : i32, i32
  }
  func.func @transform_4(%arg0: i32) -> (i32, i32) {
    %c0_i32 = arith.constant 0 : i32
    %c0_i32_0 = arith.constant 0 : i32
    %c0_i32_1 = arith.constant 0 : i32
    return %c0_i32, %c0_i32_0 : i32, i32
  }
  func.func @transform_5(%arg0: i32) -> (i32, i32) {
    %c0_i32 = arith.constant 0 : i32
    %c0_i32_0 = arith.constant 0 : i32
    %c0_i32_1 = arith.constant 0 : i32
    return %c0_i32, %c0_i32_0 : i32, i32
  }
  func.func @transform_6(%arg0: i32) -> (i32, i32) {
    %c0_i32 = arith.constant 0 : i32
    %c0_i32_0 = arith.constant 0 : i32
    %c0_i32_1 = arith.constant 0 : i32
    return %c0_i32, %c0_i32_0 : i32, i32
  }
  func.func @transform_7(%arg0: i32) -> (i32, i32) {
    %c0_i32 = arith.constant 0 : i32
    %c0_i32_0 = arith.constant 0 : i32
    return %arg0, %c0_i32 : i32, i32
  }
}

</mosaic_0001>

<bundles_post_ra>
// kernel: tpu_custom_call.1
= control target key start
LH: loop header
LB: loop body
LE: loop exit
PB: predicated region body
PF: predicated region fallthrough
CT: control target
= control target key end

     0   :  { %12 = vsyncpa [#allocation3], 0  ;;  %s2265_s0 = inlined_call_operand.hbm [shape: f32[16,16], index: 0, kind: input, shape index: {}]   ;;  %s2266_s1 = inlined_call_operand.hbm [shape: f32[16,56], index: 1, kind: input, shape index: {}]   ;;  %s2267_s2 = inlined_call_operand.hbm [shape: f32[56,56], index: 2, kind: input, shape index: {}]   ;;  %s2268_s3 = inlined_call_operand.hbm [shape: f32[56,56], index: 3, kind: input, shape index: {}]   ;;  %s2269_s4 = inlined_call_operand.hbm [shape: f32[56,56], index: 4, kind: input, shape index: {}]   ;;  %s2270_s5 = inlined_call_operand.hbm [shape: f32[32,128], index: 5, kind: input, shape index: {}]   ;;  %s2271_s6 = inlined_call_operand.vmem [shape: f32[8,56], index: 6, kind: input, shape index: {}]   ;;  %s2272_s7 = inlined_call_operand.hbm [shape: f32[16,256], index: 7, kind: output, shape index: {}]  }
   0x1   :  { %14 = vsyncpa [#allocation3 + $0x1], 0 }
   0x2   :  { %15 = vsyncpa [#allocation6], 0 }
   0x3   :  { %16 = vsyncpa [#allocation9], 0 }
   0x4   :  { %17 = vsyncpa [#allocation12], 0 }
   0x5   :  { %18 = vsyncpa [#allocation4], 0 }
   0x6   :  { %20 = vsyncpa [#allocation4 + $0x1], 0  ;;  %s1863_s24 = smov 0   ;;  %s1865_s25 = smov 0  }
   0x7   :  { %s1867_s26 = smov 0   ;;  %s1869_s27 = smov 0  }
   0x8 LB: > { %s1797_s28 = smov [#allocation5]   ;;  %s1884_s30 = sadd.s32 4294967295, %s1795_s27   ;;  %s1795_s27 = sphi %s1869_s27, %s2297_s27   ;;  %s1791_s26 = sphi %s1867_s26, %s2296_s26   ;;  %s1787_s25 = sphi %s1865_s25, %s2295_s25   ;;  %s1783_s24 = sphi %s1863_s24, %s2294_s24  }
   0x9   : > { %s221_s29 = sshll.u32 %s1797_s28, 4  ;;  %p1250_p0 = scmp.ge.s32.totalorder %s1795_s27, 1  ;;  %s1889_s29 = int_to_ptr.vmem [resolvable:$true] %s221_s29 }
   0xa   : > { %p2273_p1 = scmp.eq.s32.totalorder %s1884_s30, 0  ;;  %p209_p2 = scmp.lt.s32.totalorder %s1795_s27, 3 }
   0xb   : > { %s1798_s9 = smov [#allocation8]   ;;  %s1799_s12 = smov [#allocation7]  }
   0xc   : > { %p1891_p3 = pnand %p1250_p0, %p209_p2  ;;  %s247_s10 = sshll.u32 %s1798_s9, 4  ;;  %s1904_s10 = int_to_ptr.vmem [resolvable:$true] %s247_s10 }
   0xd   : > { %s234_s13 = sshll.u32 %s1799_s12, 4  ;;  %s1547_s16 = scalar_lea.hbm %s2266_s1, 256  ;;  %s1906_s13 = int_to_ptr.vmem [resolvable:$true] %s234_s13 }
   0xe   : > { %s2276_s8 = scalar_select %p1891_p3, 1, 0 }
   0xf   : > { %p1451_p5 = pneg %p1891_p3  ;;  %p1548_p7 = scmp.ne.s32.totalorder %s2266_s1, %s1547_s16 }
  0x10   : > { %p1554_p11 = scmp.lt.u32.totalorder %s1547_s16, %s2266_s1 }
  0x11   : > { %p1900_p6 = pnand %p1451_p5, %p2273_p1 }
  0x13   : > { %p1916_p8 = pneg %p1900_p6 }
  0x15   : > { %p1550_p9 = pnand %p1916_p8, %p1548_p7 }
  0x17   : > { %p1551_p10 = pneg %p1550_p9 }
  0x19   : > { %p1556_p12 = pnand %p1554_p11, %p1551_p10 }
  0x1b   : > { %1559 = shalt.err (!%p1556_p12)
}
  0x1c   : > { %s1560_s22 = scalar_lea.vmem %s1889_s29, 256  ;;  %p1568_p5 = scmp.lt.s32.totalorder %s1889_s29, %s1889_s29 }
  0x1d   : > { %p1561_p13 = scmp.ne.s32.totalorder %s1889_s29, %s1560_s22  ;;  %p1569_p4 = scmp.lt.s32.totalorder %s1560_s22, %s1560_s22 }
  0x1f   : > { %p1563_p0 = pnand %p1561_p13, %p1916_p8  ;;  %p1570_p7 = por %p1569_p4, %p1568_p5 }
  0x21   : > { %p1564_p2 = pneg %p1563_p0 }
  0x23   : > { %p1571_p9 = pnand %p1570_p7, %p1564_p2 }
  0x25   : > { %1574 = shalt.err (!%p1571_p9)
}
  0x26   : > { %s1800_s23 = smov 128   ;;  %s1801_s28 = smov 8  }
  0x27   : > { %1454 = dma.hbm_to_vmem [thread:$0]  (!%p1900_p6), %s2266_s1, 256, %s1889_s29, [#allocation6], %s1800_s23, %s1800_s23, %s1801_s28  }
  0x28   : > { %s1575_s16 = scalar_lea.hbm %s2268_s3, 896 }
  0x29   : > { %p1576_p4 = scmp.ne.s32.totalorder %s2268_s3, %s1575_s16  ;;  %p1582_p12 = scmp.lt.u32.totalorder %s1575_s16, %s2268_s3 }
  0x2b   : > { %p1578_p10 = pnand %p1576_p4, %p1916_p8 }
  0x2d   : > { %p1579_p11 = pneg %p1578_p10 }
  0x2f   : > { %p1584_p13 = pnand %p1582_p12, %p1579_p11 }
  0x31   : > { %1587 = shalt.err (!%p1584_p13)
}
  0x32   : > { %s1588_s29 = scalar_lea.vmem %s1904_s10, 896  ;;  %p1596_p7 = scmp.lt.s32.totalorder %s1904_s10, %s1904_s10 }
  0x33   : > { %p1589_p0 = scmp.ne.s32.totalorder %s1904_s10, %s1588_s29  ;;  %p1597_p9 = scmp.lt.s32.totalorder %s1588_s29, %s1588_s29 }
  0x35   : > { %p1591_p2 = pnand %p1589_p0, %p1916_p8  ;;  %p1598_p4 = por %p1597_p9, %p1596_p7 }
  0x37   : > { %p1592_p5 = pneg %p1591_p2 }
  0x39   : > { %p1599_p10 = pnand %p1598_p4, %p1592_p5 }
  0x3b   : > { %1602 = shalt.err (!%p1599_p10)
}
  0x3c   : > { %1460 = dma.hbm_to_vmem [thread:$0]  (!%p1900_p6), %s2268_s3, 896, %s1904_s10, [#allocation9], %s1800_s23, %s1800_s23, %s1801_s28  }
  0x3d   : > { %s1603_s15 = scalar_lea.hbm %s2267_s2, 896 }
  0x3e   : > { %p1604_p11 = scmp.ne.s32.totalorder %s2267_s2, %s1603_s15  ;;  %p1610_p0 = scmp.lt.u32.totalorder %s1603_s15, %s2267_s2 }
  0x40   : > { %p1606_p12 = pnand %p1604_p11, %p1916_p8 }
  0x42   : > { %p1607_p13 = pneg %p1606_p12 }
  0x44   : > { %p1612_p2 = pnand %p1610_p0, %p1607_p13 }
  0x46   : > { %1615 = shalt.err (!%p1612_p2)
}
  0x47   : > { %s1616_s10 = scalar_lea.vmem %s1906_s13, 896  ;;  %p1624_p4 = scmp.lt.s32.totalorder %s1906_s13, %s1906_s13 }
  0x48   : > { %p1617_p5 = scmp.ne.s32.totalorder %s1906_s13, %s1616_s10  ;;  %p1625_p10 = scmp.lt.s32.totalorder %s1616_s10, %s1616_s10 }
  0x4a   : > { %p1619_p7 = pnand %p1617_p5, %p1916_p8  ;;  %p1626_p11 = por %p1625_p10, %p1624_p4 }
  0x4c   : > { %p1620_p9 = pneg %p1619_p7 }
  0x4e   : > { %p1627_p12 = pnand %p1626_p11, %p1620_p9 }
  0x50   : > { %1630 = shalt.err (!%p1627_p12)
}
  0x51   : > { %1457 = dma.hbm_to_vmem [thread:$0]  (!%p1900_p6), %s2267_s2, 896, %s1906_s13, [#allocation6], %s1800_s23, %s1800_s23, %s1801_s28  }
  0x52   : > { %s1802_s22 = smov [#allocation10]   ;;  %s1803_s12 = smov [#allocation11]  }
  0x53   : > { %s260_s9 = sshll.u32 %s1802_s22, 4  ;;  %s273_s14 = sshll.u32 %s1803_s12, 4  ;;  %s261_s9 = int_to_ptr.vmem [resolvable:$true] %s260_s9  ;;  %s274_s14 = int_to_ptr.vmem [resolvable:$true] %s273_s14 }
  0x54   : > { %s1631_s17 = scalar_lea.hbm %s2269_s4, 896 }
  0x55   : > { %p1632_p13 = scmp.ne.s32.totalorder %s2269_s4, %s1631_s17  ;;  %p1638_p5 = scmp.lt.u32.totalorder %s1631_s17, %s2269_s4 }
  0x57   : > { %p1634_p0 = pnand %p1632_p13, %p1916_p8 }
  0x59   : > { %p1635_p2 = pneg %p1634_p0 }
  0x5b   : > { %p1640_p7 = pnand %p1638_p5, %p1635_p2 }
  0x5d   : > { %1643 = shalt.err (!%p1640_p7)
}
  0x5e   : > { %s1644_s13 = scalar_lea.vmem %s261_s9, 896  ;;  %p1652_p11 = scmp.lt.s32.totalorder %s261_s9, %s261_s9 }
  0x5f   : > { %p1645_p9 = scmp.ne.s32.totalorder %s261_s9, %s1644_s13  ;;  %p1653_p12 = scmp.lt.s32.totalorder %s1644_s13, %s1644_s13 }
  0x61   : > { %p1647_p4 = pnand %p1645_p9, %p1916_p8  ;;  %p1654_p1 = por %p1653_p12, %p1652_p11 }
  0x63   : > { %p1648_p10 = pneg %p1647_p4 }
  0x65   : > { %p1655_p3 = pnand %p1654_p1, %p1648_p10 }
  0x67   : > { %1658 = shalt.err (!%p1655_p3)
}
  0x68   : > { %1463 = dma.hbm_to_vmem [thread:$0]  (!%p1900_p6), %s2269_s4, 896, %s261_s9, [#allocation9], %s1800_s23, %s1800_s23, %s1801_s28  }
  0x69   : > { %s1659_s16 = scalar_lea.hbm %s2270_s5, 512 }
  0x6a   : > { %p1660_p1 = scmp.ne.s32.totalorder %s2270_s5, %s1659_s16  ;;  %p1666_p0 = scmp.lt.u32.totalorder %s1659_s16, %s2270_s5 }
  0x6c   : > { %p1662_p3 = pnand %p1660_p1, %p1916_p8 }
  0x6e   : > { %p1663_p13 = pneg %p1662_p3 }
  0x70   : > { %p1668_p2 = pnand %p1666_p0, %p1663_p13 }
  0x72   : > { %1671 = shalt.err (!%p1668_p2)
}
  0x73   : > { %s1672_s21 = scalar_lea.vmem %s274_s14, 512  ;;  %p1680_p4 = scmp.lt.s32.totalorder %s274_s14, %s274_s14 }
  0x74   : > { %p1673_p5 = scmp.ne.s32.totalorder %s274_s14, %s1672_s21  ;;  %p1681_p10 = scmp.lt.s32.totalorder %s1672_s21, %s1672_s21 }
  0x76   : > { %p1675_p7 = pnand %p1673_p5, %p1916_p8  ;;  %p1682_p11 = por %p1681_p10, %p1680_p4 }
  0x78   : > { %p1676_p9 = pneg %p1675_p7 }
  0x7a   : > { %p1683_p12 = pnand %p1682_p11, %p1676_p9 }
  0x7c   : > { %1686 = shalt.err (!%p1683_p12)
}
  0x7d   : > { %1466 = dma.hbm_to_vmem [thread:$0]  (!%p1900_p6), %s2270_s5, 512, %s274_s14, [#allocation12], %s1800_s23, %s1800_s23, %s1801_s28  }
  0x7e   : > { %s1249_s11 = sadd.s32 4294967294, %s1795_s27   ;;  %s2036_s19 = sadd.s32 1, %s1795_s27  }
  0x7f   : > { %s33_s29 = sadd.s32 1, %s1791_s26  ;;  %s30_s22 = ssub.s32 %s1795_s27, %s2036_s19 }
  0x80   : > { %p40_p8 = scmp.ne.s32.totalorder %s1791_s26, %s1787_s25  ;;  %p31_p1 = scmp.eq.s32.totalorder %s30_s22, 0 }
  0x81   : > { %p41_p3 = scmp.eq.s32.totalorder %s1795_s27, 0  ;;  %p46_p13 = scmp.ne.s32.totalorder %s1787_s25, %s1783_s24 }
  0x82   : > { %p196_p0 = scmp.eq.s32.totalorder %s1884_s30, 1  ;;  %p2279_p5 = scmp.eq.s32.totalorder %s1884_s30, 0 }
  0x83   : > { %s2048_s12 = scalar_select %p31_p1, %s1791_s26, %s33_s29  }
  0x84   : > { %p42_p2 = por %p41_p3, %p40_p8  ;;  %p2052_p7 = por %p2279_p5, %p46_p13 }
  0x85   : > { %p2056_p6 = por %p196_p0, %p40_p8  ;;  %p202_p9 = scmp.eq.s32.totalorder %s1249_s11, 1 }
  0x86   : > { %p1480_p4 = scmp.lt.s32.totalorder %s1795_s27, 2  ;;  %s290_s28 = sand.u32 1, %s1791_s26  }
  0x87   : > { %s2281_s23 = scalar_select %p2056_p6, 1, 0 }
  0x88   : > { %p2062_p10 = por %p202_p9, %p46_p13  ;;  %s1257_s16 = sshll.u32 %s290_s28, 3 }
  0x89   : > { %s1258_s17 = sshll.u32 %s1795_s27, 7  ;;  %s294_s21 = scalar_lea.vmem [#allocation2], %s1257_s16 }
  0x8a   : > { %s2282_s14 = scalar_select %p2062_p10, 1, 0 }
  0x8b   : > { %s2070_s10 = scalar_lea.hbm %s2265_s0, %s1258_s17  ;;  %s301_s9 = sshll.u32 %s294_s21, 4  ;;  %s2076_s9 = int_to_ptr.vmem [resolvable:$true] %s301_s9 }
  0x8c   : > { %p2072_p11 = pnand %p1480_p4, %p42_p2  ;;  %s291_s11 = scalar_lea.sflag [#allocation3], %s290_s28 }
  0x8d   : > { %s1687_s29 = scalar_lea.hbm %s2070_s10, 128  ;;  %s1692_s17 = scalar_lea.hbm %s2265_s0, 256 }
  0x8e   : > { %p1688_p12 = scmp.ne.s32.totalorder %s2070_s10, %s1687_s29  ;;  %p1689_p8 = pneg %p2072_p11 }
  0x8f   : > { %p1693_p13 = scmp.lt.u32.totalorder %s2070_s10, %s2265_s0  ;;  %p1694_p0 = scmp.lt.u32.totalorder %s1692_s17, %s1687_s29 }
  0x90   : > { %p1690_p1 = pnand %p1689_p8, %p1688_p12  ;;  %p1696_p5 = scmp.lt.u32.totalorder %s1687_s29, %s2070_s10 }
  0x91   : > { %p1695_p2 = por %p1694_p0, %p1693_p13 }
  0x92   : > { %p1691_p3 = pneg %p1690_p1 }
  0x93   : > { %p1697_p9 = por %p1696_p5, %p1695_p2 }
  0x95   : > { %p1698_p4 = pnand %p1697_p9, %p1691_p3 }
  0x97   : > { %1701 = shalt.err (!%p1698_p4)
}
  0x98   : > { %s1702_s28 = scalar_lea.vmem %s2076_s9, 128  ;;  %s1804_s21 = smov [#allocation2]  }
  0x99   : > { %p1703_p12 = scmp.ne.s32.totalorder %s2076_s9, %s1702_s28  ;;  %s1707_s22 = sshll.u32 %s1804_s21, 4  ;;  %s1708_s22 = int_to_ptr.vmem [resolvable:$false] %s1707_s22 }
  0x9a   : > { %s1709_s16 = scalar_lea.vmem %s1708_s22, 256  ;;  %p1710_p6 = scmp.lt.s32.totalorder %s2076_s9, %s1708_s22 }
  0x9b   : > { %p1705_p1 = pnand %p1703_p12, %p1689_p8  ;;  %p1711_p13 = scmp.lt.s32.totalorder %s1709_s16, %s1702_s28 }
  0x9d   : > { %p1706_p10 = pneg %p1705_p1  ;;  %p1712_p0 = por %p1711_p13, %p1710_p6 }
  0x9f   : > { %p1713_p2 = pnand %p1712_p0, %p1706_p10 }
  0xa1   : > { %1716 = shalt.err (!%p1713_p2)
}
  0xa2   : > { %1470 = dma.hbm_to_vmem [thread:$0]  (!%p2072_p11), %s2070_s10, 128, %s2076_s9, %s291_s11  }
  0xa3   : > { %p2284_p3 = scmp.ne.s32.totalorder %s2276_s8, 0 }
  0xa4   : > { %s2106_s29 = sand.u32 (!%p2284_p3), 1, %s1787_s25  }
  0xa5   : > { %310 = sbr.rel (%p2284_p3) target bundleno = 1645 (0x66d), region = 48  ;;  %s1260_s17 = sshll.u32 (!%p2284_p3), %s2106_s29, 3 }
  0xa6   : > { %s313_s18 = scalar_lea.sflag (!%p2284_p3), [#allocation3], %s2106_s29  ;;  %s316_s20 = scalar_lea.vmem (!%p2284_p3), [#allocation2], %s1260_s17 }
  0xac   : > { %1762 = dma.done.wait (%p2052_p7), %s313_s18, 128  }
  0xad   : > { %1764 = vsyncadd (%p2052_p7), %s313_s18, 4294967168  ;;  %p2285_p6 = scmp.eq.s32.totalorder %s1884_s30, 0 }
  0xaf   : > { %1766 = dma.done.wait (%p2285_p6), [#allocation6], 1152   ;;  %p2286_p10 = pmov %p2285_p6 }
  0xb0   : > { %p2287_p11 = pmov %p2285_p6 }
  0xb1   : > { %1768 = vsyncadd (%p2286_p10), [#allocation6], 4294966144 }
  0xb2   : > { %1770 = dma.done.wait (%p2287_p11), [#allocation9], 1792   ;;  %p2288_p8 = pmov %p2285_p6 }
  0xb3   : > { %p2289_p5 = pmov %p2285_p6 }
  0xb4   : > { %1772 = vsyncadd (%p2288_p8), [#allocation9], 4294965504 }
  0xb5   : > { %1774 = dma.done.wait (%p2289_p5), [#allocation12], 512   ;;  %p2290_p9 = pmov %p2289_p5 }
  0xb6   : > { %v1805_v0 = vmov 0.0|0.0   ;;  %vm1806_vm0 = vmmov 0   ;;  %v1807_v1 = vmov 0.0   ;;  %v369_v2 = vld [vmem:[#allocation5] sm:$0xff]  ;;  %v370_v3 = vld [vmem:[#allocation5 + $0x8] sm:$0xff]  ;;  %v450_v5 = vld [vmem:[#allocation7] sm:$0xff]  ;;  %v371_v22 = vlaneseq }
  0xb7   : > { %1776 = vsyncadd (%p2290_p9), [#allocation12], 4294966784  ;;  %1387 = vmatprep.subr.bf16.mxu0 %v1805_v0  ;;  %1322 = vmatprep.mubr.msk.f32.mxu0 %vm1806_vm0, %v1807_v1  ;;  %v1388_v4 = vpack.c.bf16 %v370_v3, %v369_v2  ;;  %v451_v6 = vld [vmem:[#allocation7 + $0x8] sm:$0xff]  ;;  %v452_v7 = vld [vmem:[#allocation7 + $0x10] sm:$0xff]  ;;  %vm375_vm1 = vcmask 130048   ;;  %vm461_vm2 = vcmask 457728  }
  0xb8   : > { %1390 = vmatprep.subr.bf16.mxu1 %v1805_v0  ;;  %1339 = vmatprep.mubr.msk.f32.mxu1 %vm1806_vm0, %v1807_v1  ;;  %v1391_v8 = vpack.c.bf16 %v451_v6, %v450_v5  ;;  %v453_v9 = vld [vmem:[#allocation7 + $0x18] sm:$0xff]  ;;  %v368_v10 = vld [vmem:[%s316_s20] sm:$0xff]  ;;  %v456_v15 = vld [vmem:[#allocation7 + $0x30] sm:$0xff]  ;;  %v2141_v23 = vshrl.u32 %v371_v22, 7  ;;  %vm723_vm3 = vcmask 261120   ;;  %s1814_s10 = smov 96  }
  0xb9   : > { %1389 = vmatpush3.bf16.msra.mxu0 %v1388_v4  ;;  %v1394_v11 = vpack.c.bf16 %v453_v9, %v452_v7  ;;  %v454_v12 = vld [vmem:[#allocation7 + $0x20] sm:$0xff]  ;;  %v455_v13 = vld [vmem:[#allocation7 + $0x28] sm:$0xff]  ;;  %v536_v16 = vld [vmem:[#allocation8] sm:$0xff]  ;;  %s1815_s9 = smov 32   ;;  %s1816_s13 = smov 104  }
  0xba   : > { %1392 = vmatpush3.bf16.msra.mxu1 %v1391_v8  ;;  %1399 = vmatprep.subr.bf16.mxu0 %v1805_v0  ;;  %v1397_v14 = vpack.c.bf16 %v455_v13, %v454_v12  ;;  %v537_v17 = vld [vmem:[#allocation8 + $0x8] sm:$0xff]  ;;  %v538_v18 = vld [vmem:[#allocation8 + $0x10] sm:$0xff]  ;;  %v539_v20 = vld [vmem:[#allocation8 + $0x18] sm:$0xff]  ;;  %v373_v24 = vsub.s32 0, %v2141_v23  ;;  %v459_v41 = vsub.s32 1, %v2141_v23  ;;  %v545_v51 = vsub.s32 2, %v2141_v23 }
  0xbb   : > { %1393 = vmatprep.subr.bf16.mxu1 %v1805_v0  ;;  %v1400_v19 = vpack.c.bf16 %v537_v17, %v536_v16  ;;  %v1403_v21 = vpack.c.bf16 %v539_v20, %v538_v18  ;;  %v2147_v25 = vld [vmem:[%s2271_s6] sm:$0xff]  ;;  %v540_v31 = vld [vmem:[#allocation8 + $0x20] sm:$0xff]  ;;  %v542_v34 = vld [vmem:[#allocation8 + $0x30] sm:$0xff]  ;;  %v630_v63 = vsub.s32 3, %v2141_v23  ;;  %v711_v6 = vsub.s32 5, %v2141_v23  ;;  %s1817_s11 = smov 72  }
  0xbc   : > { %1323 = vmatmul.mubr.msk.f32.vlgmr.msra.gmra.mrb[0].mxu0 %vm375_vm1, %v368_v10  ;;  %v374_v26 = vrot.slane %v2147_v25, %v373_v24  ;;  %v541_v32 = vld [vmem:[#allocation8 + $0x28] sm:$0xff]  ;;  %v621_v35 = vld [vmem:[#allocation10] sm:$0xff]  ;;  %v622_v36 = vld [vmem:[#allocation10 + $0x8] sm:$0xff]  ;;  %v460_v42 = vrot.slane %v2147_v25, %v459_v41  ;;  %v546_v52 = vrot.slane %v2147_v25, %v545_v51  ;;  %v716_v8 = vsub.s32 4, %v2141_v23  ;;  %s1818_s28 = smov 56   ;;  %s1819_s21 = smov 8  }
  0xbd   : > { %1356 = vmatprep.mubr.msk.f32.mxu0 %vm1806_vm0, %v1807_v1  ;;  %1401 = vmatpush3.bf16.msra.mxu0 %v1400_v19  ;;  %v1406_v33 = vpack.c.bf16 %v541_v32, %v540_v31  ;;  %v623_v37 = vld [vmem:[#allocation10 + $0x10] sm:$0xff]  ;;  %v1409_v38 = vpack.c.bf16 %v622_v36, %v621_v35  ;;  %v624_v39 = vld [vmem:[#allocation10 + $0x18] sm:$0xff]  ;;  %v625_v47 = vld [vmem:[#allocation10 + $0x20] sm:$0xff]  ;;  %v1810_v31 = vmov 2131351028   ;;  %s1820_s22 = smov 112  }
  0xbe   : > { %1395 = vmatpush3.bf16.msra.mxu1 %v1394_v11  ;;  %1402 = vmatprep.subr.bf16.mxu0 %v1805_v0  ;;  %v1412_v40 = vpack.c.bf16 %v624_v39, %v623_v37  ;;  %v626_v48 = vld [vmem:[#allocation10 + $0x28] sm:$0xff]  ;;  %v627_v50 = vld [vmem:[#allocation10 + $0x30] sm:$0xff]  ;;  %v719_v57 = vld [vmem:[#allocation11] sm:$0xff]  ;;  %v717_v11 = vrot.slane %v2147_v25, %v716_v8  ;;  %v1812_v37 = vmov 920167782   ;;  %s1821_s16 = smov 88  }
  0xbf   : > { %1396 = vmatprep.subr.bf16.mxu1 %v1805_v0  ;;  %v1415_v49 = vpack.c.bf16 %v626_v48, %v625_v47  ;;  %v720_v58 = vld [vmem:[#allocation11 + $0x8] sm:$0xff]  ;;  %v721_v60 = vld [vmem:[#allocation11 + $0x10] sm:$0xff]  ;;  %v722_v61 = vld [vmem:[#allocation11 + $0x18] sm:$0xff]  ;;  %s1266_s17 = sshll.u32 %s2106_s29, 4  ;;  %s1285_s18 = sshll.u32 %s1884_s30, 8 }
  0xc0   : > { %v1418_v59 = vpack.c.bf16 %v720_v58, %v719_v57  ;;  %v1421_v62 = vpack.c.bf16 %v722_v61, %v721_v60  ;;  %s366_s20 = scalar_lea.vmem [#allocation13], %s1266_s17  ;;  %s1117_s30 = scalar_lea.sflag [#allocation4], %s2106_s29 }
  0xc1   : > { %1404 = vmatpush3.bf16.msra.mxu0 %v1403_v21  ;;  %s1131_s8 = sshll.u32 %s366_s20, 4  ;;  %p2291_p4 = scmp.ne.s32.totalorder %s2281_s23, 0  ;;  %s2222_s8 = int_to_ptr.vmem [resolvable:$true] %s1131_s8 }
  0xc2   : > { %1398 = vmatpush3.bf16.msra.mxu1 %v1397_v14  ;;  %1405 = vmatprep.subr.bf16.mxu0 %v1805_v0 }
  0xc3   : > { %1337 = vmatprep.subr.mxu1 %v1807_v1 }
  0xc5   : > { %1407 = vmatpush3.bf16.msra.mxu0 %v1406_v33 }
  0xc6   : > { %1338 = vmatpush3.msra.mxu1 %v456_v15  ;;  %1354 = vmatprep.subr.mxu0 %v1807_v1 }
  0xc7   : > { %1408 = vmatprep.subr.bf16.mxu1 %v1805_v0 }
  0xc9   : > { %1355 = vmatpush3.msra.mxu0 %v542_v34  ;;  %v1811_v34 = vmov 2102212464  }
  0xca   : > { %1417 = vmatprep.subr.bf16.mxu0 %v1805_v0 }
 0x18f   : > { %v445_v27 = vpop.f32.mrb[0].mxu0 }
 0x190   : > { %v446_v28 = vadd.f32 %v445_v27, %v374_v26  ;;  %v1324_v29 = vpop.f32.mrb[1].mxu0  ;;  %v1808_v26 = vmov 683565275  }
 0x192   : > { %v449_v30 = vmax.f32 %v446_v28, 0.0  ;;  %v1809_v28 = vmov 2475754826  }
 0x194   : > { %1340 = vmatmul.mubr.msk.f32.vlgmr.msra.gmra.mrb[0].mxu1 %vm461_vm2, %v449_v30 }
 0x195   : > { %1373 = vmatprep.mubr.msk.f32.mxu1 %vm1806_vm0, %v1807_v1  ;;  %1410 = vmatpush3.bf16.msra.mxu1 %v1409_v38 }
 0x196   : > { %1411 = vmatprep.subr.bf16.mxu1 %v1805_v0 }
 0x199   : > { %1413 = vmatpush3.bf16.msra.mxu1 %v1412_v40  ;;  %v1813_v40 = vmov 1326507024  }
 0x19a   : > { %1414 = vmatprep.subr.bf16.mxu1 %v1805_v0 }
 0x19d   : > { %1416 = vmatpush3.bf16.msra.mxu1 %v1415_v49 }
 0x19e   : > { %1371 = vmatprep.subr.mxu1 %v1807_v1 }
 0x1a1   : > { %1372 = vmatpush3.msra.mxu1 %v627_v50 }
 0x267   : > { %v531_v43 = vpop.f32.mrb[0].mxu1 }
 0x268   : > { %v532_v44 = vadd.f32 %v531_v43, %v460_v42  ;;  %v1341_v45 = vpop.f32.mrb[1].mxu1 }
 0x26a   : > { %v535_v46 = vmax.f32 %v532_v44, 0.0 }
 0x26c   : > { %1357 = vmatmul.mubr.msk.f32.vlgmr.msra.gmra.mrb[2].mxu0 %vm461_vm2, %v535_v46 }
 0x26d   : > { %1384 = vmatprep.mubr.msk.f32.mxu0 %vm1806_vm0, %v1807_v1  ;;  %1419 = vmatpush3.bf16.msra.mxu0 %v1418_v59  ;;  %v631_v1 = vrot.slane %v2147_v25, %v630_v63 }
 0x26e   : > { %1420 = vmatprep.subr.bf16.mxu0 %v1805_v0  ;;  %v712_v0 = vrot.slane %v2147_v25, %v711_v6 }
 0x271   : > { %1422 = vmatpush3.bf16.msra.mxu0 %v1421_v62 }
 0x33f   : > { %v616_v53 = vpop.f32.mrb[2].mxu0 }
 0x340   : > { %v617_v54 = vadd.f32 %v616_v53, %v546_v52  ;;  %v1358_v55 = vpop.f32.mrb[3].mxu0 }
 0x342   : > { %v620_v56 = vmax.f32 %v617_v54, 0.0 }
 0x344   : > { %1374 = vmatmul.mubr.msk.f32.vlgmr.msra.gmra.mrb[2].mxu1 %vm461_vm2, %v620_v56 }
 0x417   : > { %v701_v2 = vpop.f32.mrb[2].mxu1 }
 0x418   : > { %v702_v3 = vadd.f32 %v701_v2, %v631_v1  ;;  %v1375_v4 = vpop.f32.mrb[3].mxu1 }
 0x41a   : > { %v705_v5 = vmul.f32 0.16666667, %v702_v3 }
 0x41c   : > { %v706_v7 = vadd.f32 0.5, %v705_v5 }
 0x41e   : > { %v707_v9 = vmax.f32 %v706_v7, 0.0 }
 0x420   : > { %v708_v10 = vmin.f32 %v707_v9, 1.0 }
 0x422   : > { %v713_v12 = vmul.f32 %v712_v0, %v708_v10 }
 0x424   : > { %v2173_v13 = vadd.f32 %v717_v11, %v713_v12 }
 0x426   : > { %v808_v14 = vand.u32 2139095040, %v2173_v13  ;;  %1385 = vmatmul.mubr.msk.f32.vlgmr.msra.gmra.mrb[4].mxu0 %vm723_vm3, %v2173_v13  ;;  %v805_v18 = vand.u32 2147483647, %v2173_v13  ;;  %vm807_vm11 = vcmp.lt.s32.totalorder %v2173_v13, 0 }
 0x428   : > { %v809_v15 = vshrl.u32 %v808_v14, 23  ;;  %v812_v21 = vand.u32 8388607, %v805_v18  ;;  %vm806_vm12 = vcmp.le.f32.partialorder %v805_v18, 0.7853982 }
 0x42a   : > { %v1272_v16 = vadd.s32 4294967169, %v809_v15  ;;  %v813_v42 = vor.u32 8388608, %v812_v21 }
 0x42c   : > { %v815_v17 = vadd.s32 1, %v1272_v16  ;;  %v853_v56 = vshll.u32 %v813_v42, 8 }
 0x42e   : > { %vm816_vm4 = vcmp.gt.s32.totalorder %v815_v17, 0 }
 0x42f   : > { %v817_v19 = vsel %vm816_vm4, %v815_v17, 0  ;;  %vm897_vm4 = vweird.f32 %v2173_v13 }
 0x430   : > { %v819_v20 = vand.u32 31, %v817_v19  ;;  %v818_v24 = vshrl.u32 %v817_v19, 5 }
 0x432   : > { %v820_v22 = vsub.s32 32, %v819_v20  ;;  %v822_v27 = vshll.u32 %v1808_v26, %v819_v20  ;;  %v825_v29 = vshll.u32 %v1809_v28, %v819_v20  ;;  %v828_v33 = vshll.u32 %v1810_v31, %v819_v20 }
 0x433   : > { %v831_v36 = vshll.u32 %v1811_v34, %v819_v20  ;;  %v834_v39 = vshll.u32 %v1812_v37, %v819_v20  ;;  %vm837_vm5 = vcmp.lt.s32.totalorder %v818_v24, 1  ;;  %vm840_vm6 = vcmp.lt.s32.totalorder %v818_v24, 4 }
 0x434   : > { %v823_v30 = vshrl.u32 %v1809_v28, %v820_v22  ;;  %v826_v32 = vshrl.u32 %v1810_v31, %v820_v22  ;;  %v829_v35 = vshrl.u32 %v1811_v34, %v820_v22  ;;  %v832_v38 = vshrl.u32 %v1812_v37, %v820_v22 }
 0x435   : > { %v835_v41 = vshrl.u32 %v1813_v40, %v820_v22  ;;  %v821_v51 = vshrl.u32 %v1808_v26, %v820_v22  ;;  %vm839_vm7 = vcmp.lt.s32.totalorder %v818_v24, 3  ;;  %vm838_vm8 = vcmp.lt.s32.totalorder %v818_v24, 2 }
 0x436   : > { %v824_v43 = vor.u32 %v823_v30, %v822_v27  ;;  %v827_v44 = vor.u32 %v826_v32, %v825_v29  ;;  %v830_v45 = vor.u32 %v829_v35, %v828_v33  ;;  %v833_v46 = vor.u32 %v832_v38, %v831_v36 }
 0x437   : > { %v836_v47 = vor.u32 %v835_v41, %v834_v39 }
 0x438   : > { %v842_v48 = vsel %vm840_vm6, %v830_v45, 2102212464  ;;  %v845_v49 = vsel %vm837_vm5, %v824_v43, %v827_v44  ;;  %v849_v50 = vsel %vm837_vm5, %v827_v44, %v830_v45  ;;  %v846_v52 = vsel %vm840_vm6, %v833_v46, 920167782 }
 0x439   : > { %v850_v53 = vsel %vm840_vm6, %v836_v47, 1326507024  ;;  %v847_v54 = vsel %vm839_vm7, %v830_v45, %v846_v52  ;;  %v841_v57 = vsel %vm837_vm5, %v821_v51, %v824_v43  ;;  %v843_v58 = vsel %vm839_vm7, %v827_v44, %v842_v48 }
 0x43a   : > { %v851_v55 = vsel %vm839_vm7, %v833_v46, %v850_v53  ;;  %v848_v59 = vsel %vm838_vm8, %v845_v49, %v847_v54  ;;  %v844_v2 = vsel %vm838_vm8, %v841_v57, %v843_v58  ;;  %v799_v51 = vsub.s32 6, %v2141_v23 }
 0x43b   : > { %v852_v60 = vsel %vm838_vm8, %v849_v50, %v851_v55  ;;  %v2184_v63 = vmul.u32.u64.low %v853_v56, %v848_v59  ;;  %v2185_v1 = vmul.u32.u64.high %v853_v56, %v848_v59, %v2184_v63  ;;  %v860_v4 = vmul.u32 %v853_v56, %v844_v2 }
 0x43c   : > { %v2181_v61 = vmul.u32.u64.low %v853_v56, %v852_v60  ;;  %v2182_v62 = vmul.u32.u64.high %v853_v56, %v852_v60, %v2181_v61  ;;  %v803_v52 = vsub.s32 7, %v2141_v23  ;;  %v800_v54 = vrot.slane %v2147_v25, %v799_v51 }
 0x43d   : > { %v863_v3 = vadd.s32 1, %v2185_v1  ;;  %vm1110_vm6 = vcmask 64512   ;;  %vm1106_vm7 = vcmask 719872   ;;  %vm1108_vm8 = vcmask 916480  }
 0x43e   : > { %vm862_vm9 = vc.u32 %v2182_v62, %v2184_v63  ;;  %v861_v16 = vadd.s32 %v2184_v63, %v2182_v62  ;;  %v804_v55 = vrot.slane %v2147_v25, %v803_v52 }
 0x43f   : > { %v864_v5 = vsel %vm862_vm9, %v863_v3, %v2185_v1 }
 0x440   : > { %v865_v6 = vadd.s32 %v864_v5, %v860_v4 }
 0x442   : > { %v866_v7 = vadd.s32 536870912, %v865_v6 }
 0x444   : > { %v867_v8 = vshrl.u32 %v866_v7, 30 }
 0x446   : > { %v868_v9 = vshll.u32 %v867_v8, 30  ;;  %v891_v31 = vsub.s32 4, %v867_v8 }
 0x448   : > { %v869_v0 = vsub.s32 %v865_v6, %v868_v9  ;;  %v892_v34 = vsel %vm807_vm11, %v891_v31, %v867_v8 }
 0x449   : > { %v894_v36 = vsel %vm806_vm12, 0, %v892_v34 }
 0x44a   : > { %v871_v10 = vsub.s32 0, %v869_v0  ;;  %v1001_v37 = vadd.s32 3, %v894_v36  ;;  %v898_v38 = vand.u32 3, %v894_v36 }
 0x44c   : > { %v1273_v11 = vmin.u32 %v871_v10, %v869_v0  ;;  %v1002_v39 = vand.u32 3, %v1001_v37  ;;  %vm903_vm13 = vcmp.eq.s32.totalorder %v898_v38, 2  ;;  %vm900_vm14 = vcmp.eq.s32.totalorder %v898_v38, 0 }
 0x44d   : > { %vm899_vm1 = vcmp.lt.s32.totalorder %v898_v38, 2 }
 0x44e   : > { %v873_v12 = vclz %v1273_v11  ;;  %vm1004_vm15 = vcmp.eq.s32.totalorder %v1002_v39, 0  ;;  %vm1007_vm0 = vcmp.eq.s32.totalorder %v1002_v39, 2  ;;  %vm1003_vm5 = vcmp.lt.s32.totalorder %v1002_v39, 2 }
 0x450   : > { %v1274_v14 = vadd.s32 4294967294, %v873_v12 }
 0x452   : > { %vm1275_vm10 = vcmp.lt.s32.totalorder %v1274_v14, 0 }
 0x453   : > { %v876_v15 = vsel %vm1275_vm10, 0, %v1274_v14 }
 0x454   : > { %v877_v17 = vsub.s32 32, %v876_v15  ;;  %v881_v19 = vsub.s32 4294967266, %v876_v15  ;;  %v878_v20 = vshll.u32 %v869_v0, %v876_v15  ;;  %v1046_v15 = vsub.f32 0.0, %v804_v55 }
 0x456   : > { %v879_v21 = vshrl.u32 %v861_v16, %v877_v17  ;;  %v882_v22 = vadd.s32 127, %v881_v19 }
 0x458   : > { %v880_v24 = vor.u32 %v879_v21, %v878_v20  ;;  %v883_v26 = vshll.u32 %v882_v22, 23 }
 0x45a   : > { %v884_v27 = vor.u32 4788187, %v883_v26  ;;  %v887_v29 = vcvt.s32.f32 %v880_v24 }
 0x45c   : > { %v885_v28 = vand.u32 2147483647, %v884_v27 }
 0x45e   : > { %v888_v30 = vmul.f32 %v887_v29, %v885_v28 }
 0x460   : > { %v889_v32 = vxor.u32 2147483648, %v888_v30 }
 0x462   : > { %v890_v33 = vsel %vm807_vm11, %v889_v32, %v888_v30 }
 0x463   : > { %v893_v35 = vsel %vm806_vm12, %v2173_v13, %v890_v33 }
 0x464   : > { %1543 = vcosq.f32 %v893_v35 }
 0x465   : > { %1545 = vsinq.f32 %v893_v35 }
 0x46e   : > { %v1544_v40 = vpop.eup %1543 }
 0x46f   : > { %v1546_v41 = vpop.eup %1545  ;;  %v904_v42 = vxor.u32 2147483648, %v1544_v40 }
 0x470   : > { %v901_v43 = vxor.u32 2147483648, %v1546_v41 }
 0x471   : > { %v905_v44 = vsel %vm903_vm13, %v904_v42, %v1546_v41  ;;  %v1009_v46 = vsel %vm1007_vm0, %v904_v42, %v1546_v41 }
 0x472   : > { %v902_v18 = vsel %vm900_vm14, %v1544_v40, %v901_v43  ;;  %v1006_v45 = vsel %vm1004_vm15, %v1544_v40, %v901_v43 }
 0x473   : > { %v906_v47 = vsel %vm899_vm1, %v902_v18, %v905_v44  ;;  %v1010_v49 = vsel %vm1003_vm5, %v1006_v45, %v1009_v46 }
 0x474   : > { %v907_v48 = vsel %vm897_vm4, nan, %v906_v47  ;;  %v1011_v50 = vsel %vm897_vm4, nan, %v1010_v49 }
 0x475   : > { %1013 = vrot.lane.b32.xlu0 %v907_v48, %s1814_s10 }
 0x479   : > { %1018 = vrot.lane.b32.xlu0 %v1011_v50, %s1814_s10 }
 0x4e7   : > { %v1014_v53 = vpop.permute.xlu0 %1013 }
 0x4e8   : > { %v1016_v57 = vmul.f32 %v1014_v53, %v800_v54  ;;  %v1023_v58 = vmul.f32 %v1014_v53, %v804_v55 }
 0x4eb   : > { %v1019_v56 = vpop.permute.xlu0 %1018 }
 0x4ec   : > { %v1021_v59 = vmul.f32 %v1019_v56, %v804_v55  ;;  %v1022_v60 = vmul.f32 %v1019_v56, %v800_v54 }
 0x4ee   : > { %v1063_v61 = vsub.f32 %v1016_v57, %v1021_v59  ;;  %v1048_v62 = vsub.f32 %v1022_v60, %v1023_v58  ;;  %v1075_v63 = vadd.f32 %v1023_v58, %v1022_v60  ;;  %v1035_v2 = vadd.f32 %v1021_v59, %v1016_v57 }
 0x4f0   : > { %1050 = vrot.lane.b32.xlu1 %v1048_v62, %s1815_s9  ;;  %1065 = vrot.lane.b32.xlu0 %v1063_v61, %s1815_s9 }
 0x4f4   : > { %1077 = vrot.lane.b32.xlu0 %v1075_v63, %s1815_s9 }
 0x4f9   : > { %v793_v23 = vpop.f32.mrb[4].mxu0 }
 0x4fa   : > { %1026 = vrot.lane.b32.xlu1 %v793_v23, %s1816_s13  ;;  %v1386_v1 = vpop.f32.mrb[5].mxu0  ;;  %v1024_v25 = vmul.f32 %v793_v23, %v793_v23  ;;  %s1717_s13 = scalar_lea.vmem %s2222_s8, 256 }
 0x4fb   : > { %p1718_p7 = scmp.ne.s32.totalorder %s2222_s8, %s1717_s13 }
 0x4fc   : > { %1059 = vrot.lane.b32.xlu0 %v1024_v25, %s1817_s11  ;;  %s1822_s11 = smov [#allocation13]  }
 0x4fd   : > { %p1719_p12 = pnand %p1718_p7, %p2291_p4 }
 0x4fe   : > { %1037 = vrot.lane.b32.xlu1 %v1035_v2, %s1815_s9 }
 0x4ff   : > { %p1720_p1 = pneg %p1719_p12 }
 0x502   : > { %1031 = vrot.lane.b32.xlu1 %v1024_v25, %s1814_s10 }
 0x562   : > { %v1051_v3 = vpop.permute.xlu1 %1050  ;;  %v1066_v4 = vpop.permute.xlu0 %1065 }
 0x566   : > { %v1078_v0 = vpop.permute.xlu0 %1077 }
 0x56c   : > { %v1027_v5 = vpop.permute.xlu1 %1026 }
 0x56d   : > { %v1029_v6 = vmul.f32 %v1027_v5, %v793_v23 }
 0x56e   : > { %v1060_v12 = vpop.permute.xlu0 %1059 }
 0x56f   : > { %v1068_v7 = vmul.f32 %v1066_v4, %v1029_v6  ;;  %v1053_v8 = vmul.f32 %v1051_v3, %v1029_v6  ;;  %v1080_v11 = vmul.f32 %v1078_v0, %v1029_v6  ;;  %v1062_v16 = vmul.f32 %v1060_v12, %v800_v54 }
 0x570   : > { %v1038_v9 = vpop.permute.xlu1 %1037  ;;  %v1074_v24 = vmul.f32 %v1060_v12, %v1046_v15 }
 0x571   : > { %1070 = vrot.lane.b32.xlu0 %v1068_v7, %s1814_s10  ;;  %1055 = vrot.lane.b32.xlu1 %v1053_v8, %s1814_s10  ;;  %v1040_v10 = vmul.f32 %v1038_v9, %v1029_v6 }
 0x574   : > { %v1032_v14 = vpop.permute.xlu1 %1031 }
 0x575   : > { %1082 = vrot.lane.b32.xlu0 %v1080_v11, %s1814_s10  ;;  %1042 = vrot.lane.b32.xlu1 %v1040_v10, %s1814_s10  ;;  %v1047_v17 = vmul.f32 %v1046_v15, %v1032_v14  ;;  %v1034_v26 = vmul.f32 %v1032_v14, %v800_v54 }
 0x579   : > { %1086 = vrot.lane.b32.xlu1 %v793_v23, %s1818_s28  ;;  %s1721_s28 = sshll.u32 %s1822_s11, 4  ;;  %s1722_s28 = int_to_ptr.vmem [resolvable:$false] %s1721_s28 }
 0x57a   : > { %p1724_p13 = scmp.lt.s32.totalorder %s2222_s8, %s1722_s28 }
 0x5e3   : > { %v1071_v19 = vpop.permute.xlu0 %1070  ;;  %v1056_v20 = vpop.permute.xlu1 %1055 }
 0x5e4   : > { %v1073_v21 = vsub.f32 %v1062_v16, %v1071_v19  ;;  %v1058_v22 = vsub.f32 %v1047_v17, %v1056_v20 }
 0x5e6   : > { %1098 = vrot.lane.b32.xlu1 %v1073_v21, %s1819_s21  ;;  %1094 = vrot.lane.b32.xlu0 %v1058_v22, %s1820_s22  ;;  %s1723_s21 = scalar_lea.vmem %s1722_s28, 512 }
 0x5e7   : > { %v1083_v27 = vpop.permute.xlu0 %1082  ;;  %v1043_v28 = vpop.permute.xlu1 %1042  ;;  %p1725_p0 = scmp.lt.s32.totalorder %s1723_s21, %s1717_s13 }
 0x5e8   : > { %v1085_v29 = vadd.f32 %v1083_v27, %v1074_v24  ;;  %v1045_v30 = vsub.f32 %v1034_v26, %v1043_v28 }
 0x5e9   : > { %p1726_p2 = por %p1725_p0, %p1724_p13 }
 0x5ea   : > { %1102 = vrot.lane.b32.xlu1 %v1085_v29, %s1815_s9  ;;  %1090 = vrot.lane.b32.xlu0 %v1045_v30, %s1821_s16  ;;  %s2220_s9 = scalar_lea.hbm %s2272_s7, %s1285_s18 }
 0x5eb   : > { %v1087_v31 = vpop.permute.xlu1 %1086  ;;  %p1727_p3 = pnand %p1726_p2, %p1720_p1 }
 0x5ec   : > { %v1105_v34 = vsel %vm461_vm2, %v2173_v13, %v1087_v31 }
 0x658   : > { %v1095_v32 = vpop.permute.xlu0 %1094  ;;  %v1099_v33 = vpop.permute.xlu1 %1098 }
 0x659   : > { %v1111_v35 = vsel %vm1110_vm6, %v1095_v32, %v1099_v33 }
 0x65c   : > { %v1091_v36 = vpop.permute.xlu0 %1090  ;;  %v1103_v37 = vpop.permute.xlu1 %1102 }
 0x65d   : > { %v1107_v38 = vsel %vm1106_vm7, %v1105_v34, %v1091_v36  ;;  %v1112_v39 = vsel %vm723_vm3, %v1111_v35, %v1103_v37 }
 0x65e   : > { %v1109_v40 = vsel %vm1108_vm8, %v1107_v38, %v1095_v32  ;;  %v1113_v41 = vsel %vm461_vm2, %v1112_v39, 0.0 }
 0x65f   : > { %1114 = vst [vmem:[%s366_s20] sm:$0xff] %v1109_v40  ;;  %1115 = vst [vmem:[%s366_s20 + $0x8] sm:$0xff] %v1113_v41 }
 0x660   : > { %1730 = shalt.err (!%p1727_p3)
}
 0x661   : > { %s1731_s29 = scalar_lea.hbm %s2220_s9, 256  ;;  %s1735_s17 = scalar_lea.hbm %s2272_s7, 512 }
 0x662   : > { %p1732_p6 = scmp.ne.s32.totalorder %s2220_s9, %s1731_s29  ;;  %p1736_p8 = scmp.lt.u32.totalorder %s2220_s9, %s2272_s7 }
 0x663   : > { %p1737_p5 = scmp.lt.u32.totalorder %s1735_s17, %s1731_s29  ;;  %p1739_p7 = scmp.lt.u32.totalorder %s1731_s29, %s2220_s9 }
 0x664   : > { %p1733_p10 = pnand %p1732_p6, %p2291_p4 }
 0x665   : > { %p1738_p9 = por %p1737_p5, %p1736_p8 }
 0x666   : > { %p1734_p11 = pneg %p1733_p10 }
 0x667   : > { %p1740_p12 = por %p1739_p7, %p1738_p9 }
 0x669   : > { %p1741_p1 = pnand %p1740_p12, %p1734_p11 }
 0x66b   : > { %1744 = shalt.err (!%p1741_p1)
}
 0x66c   : > { %1449 = dma.vmem_to_hbm [thread:$0]  (%p2291_p4), %s2222_s8, 256, %s2220_s9, %s1117_s30  }
 0x66d PF: > { %s1143_s15 = sand.u32 1, %s1783_s24   ;;  %p2292_p13 = scmp.ne.s32.totalorder %s2282_s14, 0 }
 0x66e   : > { %p2293_p0 = scmp.ge.s32.totalorder %s1795_s27, 2  ;;  %s1144_s10 = scalar_lea.sflag [#allocation4], %s1143_s15 }
 0x670   : > { %p1472_p2 = pnand %p2293_p0, %p2292_p13 }
 0x672   : > { %1778 = dma.done.wait (!%p1472_p2), %s1144_s10, 256  }
 0x673   : > { %1780 = vsyncadd (!%p1472_p2), %s1144_s10, 4294967040  ;;  %p23_p3 = scmp.ge.s32.totalorder %s2036_s19, 4   ;;  %s2294_s24 = smov %s1787_s25 }
 0x674   : > { %s2295_s25 = smov %s1791_s26  ;;  %s2296_s26 = smov %s2048_s12 }
 0x675   : > { %s2297_s27 = smov %s2036_s19  ;;  %25 = sbr.rel (!%p23_p3) target bundleno = 8 (0x8), region = 113 }
 0x67c   :  { %1149 = vsyncpa [#allocation3], 1 }
 0x67d   :  { %1151 = vsyncpa [#allocation3 + $0x1], 1 }
 0x67e   :  { %1152 = vsyncpa [#allocation6], 1 }
 0x67f   :  { %1153 = vsyncpa [#allocation9], 1 }
 0x680   :  { %1154 = vsyncpa [#allocation12], 1 }
 0x681   :  { %1155 = vsyncpa [#allocation4], 1 }
 0x682   :  { %1157 = vsyncpa [#allocation4 + $0x1], 1 }

</bundles_post_ra>
